<compile_context>
chip_gen: v5e
topology: v5e:2x2
jax: 0.10.0
libtpu: 0.0.40
codegen_flags: <defaults>
</compile_context>

<pallas_src>
import math
from functools import partial

import jax
import jax.numpy as jnp
from jax import lax
from jax.experimental import pallas as pl
from jax.experimental.pallas import tpu as pltpu

NEG = -1e30          # python float only (never a captured jnp array); acts as -inf under softmax


# ----------------------------- linear kernel (QKV) ------------------------------
def _linear_kernel(x_ref, w_ref, b_ref, o_ref):
    # bf16 x bf16 -> f32 accumulation on the MXU; bias added in f32.
    o_ref[...] = jnp.dot(x_ref[...], w_ref[...],
                         preferred_element_type=jnp.float32) + b_ref[...]


def linear(x2d, w, b, *, tm=128):
    """y = x2d @ w + b  (weights stored as (in, out)); bf16 operands, f32 accumulate."""
    M, Cin = x2d.shape
    Cout = w.shape[1]
    if M % tm:                      # toy sizes: single M tile; large M: parallel M tiles
        tm = M
    return pl.pallas_call(
        _linear_kernel,
        out_shape=jax.ShapeDtypeStruct((M, Cout), jnp.float32),
        grid=(M // tm,),
        in_specs=[pl.BlockSpec((tm, Cin), lambda i: (i, 0)),
                  pl.BlockSpec((Cin, Cout), lambda i: (0, 0)),
                  pl.BlockSpec((1, Cout), lambda i: (0, 0))],
        out_specs=pl.BlockSpec((tm, Cout), lambda i: (i, 0)),
        compiler_params=pltpu.CompilerParams(
            dimension_semantics=("parallel",)),
    )(x2d.astype(jnp.bfloat16), w.astype(jnp.bfloat16),
      b.reshape(1, Cout).astype(jnp.float32))


# ------------------------ ProbSparse attention kernel ----------------------
def _prob_attn_kernel(counts_ref, q_ref, k_ref, v_ref, wp_ref, bp_ref, o_ref,
                      *, L, H, D, u, scale):
    f32 = jnp.float32
    bf16 = jnp.bfloat16

    qb = q_ref[0]                    # (H, L, D) bf16
    kb = k_ref[0]                    # (H, L, D) bf16
    vb = v_ref[0]                    # (H, L, D) bf16
    counts = counts_ref[...]         # (L, L) f32: counts[i, c] = multiplicity of key c in row i's sample

    # ---- sampled-key sparsity measure M (vectorized: 1 weighted sum + 1 masked max) ----
    # TODO(synk): at large L compute only the L x sample_k sampled products (gathered K)
    # instead of the full (L, L) QK, and key-tile it for the v7x 64 MiB VMEM budget.
    qk = jnp.einsum('hld,hmd->hlm', qb, kb,
                    preferred_element_type=f32)                       # (H, L, L) f32
    hit = counts > 0.0                                                # (L, L) bool
    m_max = jnp.max(jnp.where(hit[None, :, :], qk, NEG), axis=-1)     # (H, L)
    m_sum = jnp.sum(qk * counts[None, :, :], axis=-1)                 # (H, L)
    m_score = m_max - m_sum * (1.0 / L)                               # (H, L) f32

    # ---- top-u queries by M (iterative argmax, ties -> smaller index, matches lax.top_k) ----
    colL = lax.broadcasted_iota(f32, (H, L), 1)                       # key/query index per column
    u_pos = lax.broadcasted_iota(jnp.int32, (H, u), 1)

    def select_body(t, carry):
        work, top_idx = carry                                         # (H, L), (H, u)
        mx = jnp.max(work, axis=-1, keepdims=True)                    # (H, 1)
        cand = jnp.where(work == mx, colL, float(L))
        idx_t = jnp.min(cand, axis=-1, keepdims=True)                 # (H, 1) argmax
        top_idx = jnp.where(u_pos == t, idx_t, top_idx)               # write slot t only
        work = jnp.where(colL == idx_t, NEG, work)
        return work, top_idx

    _, top_idx = lax.fori_loop(0, u, select_body,
                               (m_score, jnp.zeros((H, u), f32)),
                               unroll=True)                           # (H, u) f32 indices

    # ---- one-hot gather matrix for the selected queries (built once, after the loop) ----
    col_uL = lax.broadcasted_iota(f32, (u, L), 1)                     # (u, L)
    sel_b = top_idx[:, :, None] == col_uL[None]                       # (H, u, L) bool one-hot
    sel = sel_b.astype(bf16)

    # ---- scores only for the selected queries: (sel @ q) @ K^T, not sel @ qk ----
    q_sel = jnp.einsum('hul,hld->hud', sel, qb,
                       preferred_element_type=f32)                    # (H, u, D), exact gather
    scores = jnp.einsum('hud,hkd->huk', q_sel.astype(bf16), kb,
                        preferred_element_type=f32) * scale           # (H, u, L)
    # causal ProbMask: key position > selected query position (applied after scaling)
    scores = jnp.where(col_uL[None] > top_idx[:, :, None], NEG, scores)

    # ---- softmax over keys ----
    smax = jnp.max(scores, axis=-1, keepdims=True)
    p = jnp.exp(scores - smax)
    p = p * pl.reciprocal(jnp.sum(p, axis=-1, keepdims=True), approx=True)
    ctx_sel = jnp.einsum('huk,hkd->hud', p.astype(bf16), vb,
                         preferred_element_type=f32)                  # (H, u, D)

    # ---- initial context: cumulative sum of V (mask_flag=True) via lower-tri matmul ----
    # TODO(synk): for large L replace the (L, L) tri matmul with a key-tiled running sum.
    rowLL = lax.broadcasted_iota(f32, (L, L), 0)
    colLL = lax.broadcasted_iota(f32, (L, L), 1)
    tri = jnp.broadcast_to((colLL <= rowLL).astype(bf16), (H, L, L))  # lower-tri incl. diag
    ctx0 = jnp.einsum('hlm,hmd->hld', tri, vb,
                      preferred_element_type=f32)                     # (H, L, D)

    # ---- scatter the selected rows back into the context (one-hot matmul) ----
    scat = jnp.einsum('hul,hud->hld', sel, ctx_sel.astype(bf16),
                      preferred_element_type=f32)                     # (H, L, D)
    cover = jnp.sum(sel_b.astype(f32), axis=1)[:, :, None]            # (H, L, 1) in {0, 1}
    ctx = ctx0 * (1.0 - cover) + scat                                 # (H, L, D)

    # ---- lane-dense context slab, then FUSED output projection (no HBM round-trip) ----
    ctx_lc = jnp.concatenate([ctx[h] for h in range(H)], axis=-1)     # (L, C) f32
    o_ref[0] = jnp.dot(ctx_lc.astype(bf16), wp_ref[...],
                       preferred_element_type=f32) + bp_ref[...]      # (L, C) f32


def prob_attention_core(q, k, v, counts, wp, bp, *, u, scale):
    B, H, L, D = q.shape
    C = H * D
    kernel = partial(_prob_attn_kernel, L=L, H=H, D=D, u=u, scale=scale)
    return pl.pallas_call(
        kernel,
        out_shape=jax.ShapeDtypeStruct((B, L, C), jnp.float32),
        grid=(B,),
        in_specs=[pl.BlockSpec((L, L), lambda i: (0, 0)),             # counts (shared)
                  pl.BlockSpec((1, H, L, D), lambda i: (i, 0, 0, 0)),
                  pl.BlockSpec((1, H, L, D), lambda i: (i, 0, 0, 0)),
                  pl.BlockSpec((1, H, L, D), lambda i: (i, 0, 0, 0)),
                  pl.BlockSpec((C, C), lambda i: (0, 0)),             # proj weight (shared)
                  pl.BlockSpec((1, C), lambda i: (0, 0))],            # proj bias (shared)
        out_specs=pl.BlockSpec((1, L, C), lambda i: (i, 0, 0)),
        compiler_params=pltpu.CompilerParams(
            dimension_semantics=("parallel",)),                       # megacore over batch
    )(counts, q, k, v,
      wp.astype(jnp.bfloat16), bp.reshape(1, C).astype(jnp.float32))


# ----------------------------- module wrapper -------------------------------
def init_params(key, n_embd):
    ks = jax.random.split(key, 8)
    s = 1.0 / math.sqrt(n_embd)

    def w(kk): return jax.random.normal(kk, (n_embd, n_embd), jnp.float32) * s

    def b(kk): return jax.random.normal(kk, (n_embd,), jnp.float32) * s

    return dict(wk=w(ks[0]), bk=b(ks[1]), wq=w(ks[2]), bq=b(ks[3]),
                wv=w(ks[4]), bv=b(ks[5]), wp=w(ks[6]), bp=b(ks[7]))


def prob_attention_forward(params, x, index_sample, *, n_head, factor=5, scale=None):
    B, T, C = x.shape
    H = n_head
    D = C // H
    x2d = x.reshape(B * T, C)

    # Fused QKV projection: single (B*T, C) @ (C, 3C) matmul.
    # TODO(synk): could also be folded into the attention kernel (x block per batch),
    # kept separate to preserve the validated (H, L, D) head layout feed.
    wqkv = jnp.concatenate([params["wq"], params["wk"], params["wv"]], axis=1)
    bqkv = jnp.concatenate([params["bq"], params["bk"], params["bv"]])
    qkv = linear(x2d, wqkv, bqkv)                                     # (B*T, 3C) f32
    qq, kk, vv = qkv[:, :C], qkv[:, C:2 * C], qkv[:, 2 * C:]

    def to_heads(y):   # (B*T, C) -> (B, H, T, D), bf16 operands for the attention kernel
        return y.reshape(B, T, H, D).transpose(0, 2, 1, 3).astype(jnp.bfloat16)

    q, k, v = to_heads(qq), to_heads(kk), to_heads(vv)

    u = min(factor * int(math.ceil(math.log(T))), T)
    sc = scale if scale is not None else 1.0 / math.sqrt(D)

    # Host-side re-encoding of the sampled key indices as a multiplicity matrix so the
    # kernel needs no per-sample loop (counts[i, c] = #{j : index_sample[i, j] == c}).
    counts = jnp.sum(index_sample[:, :, None] == jnp.arange(T)[None, None, :],
                     axis=1).astype(jnp.float32)                      # (T, T)

    # Attention kernel also applies the output projection (proj + bias) in-kernel.
    out = prob_attention_core(q, k, v, counts, params["wp"], params["bp"],
                              u=u, scale=sc)                          # (B, T, C) f32
    # TODO(synk): attn_drop / resid_drop / dropout are identity (eval mode).
    return out


# --------------------------- pure-JAX reference -----------------------------
# Precision is matched to the kernel (bf16 matmul operands, f32 accumulation) so the
# tolerance check validates the ProbSparse logic rather than MXU rounding.
def reference_forward(params, x, index_sample, *, n_head, factor=5, scale=None):
    B, T, C = x.shape
    H, D = n_head, C // n_head
    bf16, f32 = jnp.bfloat16, jnp.float32
    x2d = x.reshape(B * T, C)

    def lin(xx, w, b):
        return jnp.dot(xx.astype(bf16), w.astype(bf16),
                       preferred_element_type=f32) + b

    Q = lin(x2d, params["wq"], params["bq"]).reshape(B, T, H, D).transpose(0, 2, 1, 3)
    K = lin(x2d, params["wk"], params["bk"]).reshape(B, T, H, D).transpose(0, 2, 1, 3)
    V = lin(x2d, params["wv"], params["bv"]).reshape(B, T, H, D).transpose(0, 2, 1, 3)

    L_Q = L_K = T
    u = min(factor * int(math.ceil(math.log(L_Q))), L_Q)
    Qb, Kb, Vb = Q.astype(bf16), K.astype(bf16), V.astype(bf16)

    K_sample = Kb[:, :, index_sample, :]                              # (B,H,Lq,S,D)
    QKs = jnp.einsum('bhqd,bhqsd->bhqs', Qb, K_sample, preferred_element_type=f32)
    M = QKs.max(-1) - QKs.sum(-1) / L_K
    M_top = jax.lax.top_k(M, u)[1]                                    # (B,H,u)

    Q_red = jnp.take_along_axis(Qb, M_top[..., None], axis=2)
    sc = scale if scale is not None else 1.0 / math.sqrt(D)
    scores = jnp.einsum('bhud,bhkd->bhuk', Q_red, Kb, preferred_element_type=f32) * sc
    mask = jnp.arange(L_K)[None, None, None, :] > M_top[..., None]    # ProbMask
    scores = jnp.where(mask, -jnp.inf, scores)
    attn = jax.nn.softmax(scores, axis=-1)

    ctx = jnp.cumsum(Vb.astype(f32), axis=2)                          # initial context
    upd = jnp.einsum('bhuk,bhkd->bhud', attn.astype(bf16), Vb, preferred_element_type=f32)
    bi = jnp.arange(B)[:, None, None]
    hi = jnp.arange(H)[None, :, None]
    ctx = ctx.at[bi, hi, M_top, :].set(upd)
    ctx = ctx.transpose(0, 2, 1, 3).reshape(B * T, C)
    out = jnp.dot(ctx.astype(bf16), params["wp"].astype(bf16),
                  preferred_element_type=f32) + params["bp"]
    return out.reshape(B, T, C)


if __name__ == "__main__":
    B, T, C, H = 2, 32, 32, 4       # batch, seq, n_embd, n_head  (D = 8)
    factor = 5
    key = jax.random.PRNGKey(0)
    kx, kp, ki = jax.random.split(key, 3)

    x = jax.random.normal(kx, (B, T, C), jnp.float32)
    params = init_params(kp, C)

    # sample_k = U_part = min(factor * ceil(ln L_K), L_K) = 20 for T = 32
    U_part = min(factor * int(math.ceil(math.log(T))), T)
    index_sample = jax.random.randint(ki, (T, U_part), 0, T, dtype=jnp.int32)

    out = prob_attention_forward(params, x, index_sample, n_head=H, factor=factor)
    out = jax.block_until_ready(out)

    ref = reference_forward(params, x, index_sample, n_head=H, factor=factor)
    assert out.shape == (B, T, C)
    assert bool(jnp.all(jnp.isfinite(out)))
    max_err = float(jnp.max(jnp.abs(out - ref)))
    assert jnp.allclose(out, ref, atol=1e-2, rtol=1e-2), max_err

    print("KERNEL_OK")
</pallas_src>

<mosaic_0001>
module attributes {stable_mosaic.version = 11 : i64} {
  func.func @_linear_kernel(%arg0: i32, %arg1: memref<64x32xbf16, #tpu.memory_space<vmem>>, %arg2: memref<32x96xbf16, #tpu.memory_space<vmem>>, %arg3: memref<1x96xf32, #tpu.memory_space<vmem>>, %arg4: memref<64x96xf32, #tpu.memory_space<vmem>>) attributes {dimension_semantics = [#tpu.dimension_semantics<parallel>], iteration_bounds = array<i64: 1>, scalar_prefetch = 0 : i64, scratch_operands = 0 : i64, tpu.core_type = #tpu.core_type<tc>, window_params = [{transform_indices = @transform_0, window_bounds = array<i64: 64, 32>}, {pipeline_mode = #tpu.pipeline_mode<synchronous>, transform_indices = @transform_1, window_bounds = array<i64: 32, 96>}, {pipeline_mode = #tpu.pipeline_mode<synchronous>, transform_indices = @transform_2, window_bounds = array<i64: 1, 96>}, {transform_indices = @transform_3, window_bounds = array<i64: 64, 96>}]} {
    %c0 = arith.constant 0 : index
    %c0_0 = arith.constant 0 : index
    %0 = vector.load %arg1[%c0, %c0_0] : memref<64x32xbf16, #tpu.memory_space<vmem>>, vector<64x32xbf16>
    %c0_1 = arith.constant 0 : index
    %c0_2 = arith.constant 0 : index
    %1 = vector.load %arg2[%c0_1, %c0_2] : memref<32x96xbf16, #tpu.memory_space<vmem>>, vector<32x96xbf16>
    %cst = arith.constant dense<0.000000e+00> : vector<64x96xf32>
    %2 = tpu.matmul %0, %1, %cst {dimension_numbers = #tpu.dot_dimension_numbers<[1], [0], [0], [1], [0, 0, 1, 1], [], []>} : vector<64x32xbf16>, vector<32x96xbf16>, vector<64x96xf32> -> vector<64x96xf32>
    %c0_3 = arith.constant 0 : index
    %c0_4 = arith.constant 0 : index
    %3 = vector.load %arg3[%c0_3, %c0_4] : memref<1x96xf32, #tpu.memory_space<vmem>>, vector<1x96xf32>
    %4 = vector.broadcast %3 : vector<1x96xf32> to vector<64x96xf32>
    %5 = arith.addf %2, %4 : vector<64x96xf32>
    %c0_5 = arith.constant 0 : index
    %c0_6 = arith.constant 0 : index
    %6 = vector.load %arg4[%c0_5, %c0_6] : memref<64x96xf32, #tpu.memory_space<vmem>>, vector<64x96xf32>
    tpu.vector_store %arg4[%c0_5, %c0_6], %5 {strides = array<i32>} : memref<64x96xf32, #tpu.memory_space<vmem>>, vector<64x96xf32>,
    return
  }
  func.func @transform_0(%arg0: i32) -> (i32, i32) {
    %c0_i32 = arith.constant 0 : i32
    %c0_i32_0 = arith.constant 0 : i32
    return %arg0, %c0_i32 : i32, i32
  }
  func.func @transform_1(%arg0: i32) -> (i32, i32) {
    %c0_i32 = arith.constant 0 : i32
    %c0_i32_0 = arith.constant 0 : i32
    %c0_i32_1 = arith.constant 0 : i32
    return %c0_i32, %c0_i32_0 : i32, i32
  }
  func.func @transform_2(%arg0: i32) -> (i32, i32) {
    %c0_i32 = arith.constant 0 : i32
    %c0_i32_0 = arith.constant 0 : i32
    %c0_i32_1 = arith.constant 0 : i32
    return %c0_i32, %c0_i32_0 : i32, i32
  }
  func.func @transform_3(%arg0: i32) -> (i32, i32) {
    %c0_i32 = arith.constant 0 : i32
    %c0_i32_0 = arith.constant 0 : i32
    return %arg0, %c0_i32 : i32, i32
  }
}

</mosaic_0001>

<bundles_post_ra>
// kernel: tpu_custom_call.1
= control target key start
LH: loop header
LB: loop body
LE: loop exit
PB: predicated region body
PF: predicated region fallthrough
CT: control target
= control target key end

     0   :  { %s258_s0 = inlined_call_operand.vmem [shape: bf16[64,32], index: 0, kind: input, shape index: {}]   ;;  %s259_s1 = inlined_call_operand.vmem [shape: bf16[32,96], index: 1, kind: input, shape index: {}]   ;;  %s260_s2 = inlined_call_operand.vmem [shape: f32[1,96], index: 2, kind: input, shape index: {}]   ;;  %s261_s3 = inlined_call_operand.hbm [shape: f32[64,96], index: 3, kind: output, shape index: {}]  }
   0x1   :  { %v166_v0 = vld [vmem:[%s259_s1 + $0x8] sm:$0xff]  ;;  %v165_v1 = vld [vmem:[%s259_s1] sm:$0xff] }
   0x2   :  { %83 = vmatpush.bf16.msra.mxu0 %v166_v0  ;;  %167 = vmatpush.bf16.msra.mxu1 %v166_v0 }
   0x3   :  { %8 = vsyncpa [#allocation3], 0  ;;  %168 = vmatpush.bf16.msra.mxu2 %v166_v0  ;;  %169 = vmatpush.bf16.msra.mxu3 %v166_v0  ;;  %v161_v2 = vld [vmem:[%s258_s0] sm:$0xff]  ;;  %v162_v3 = vld [vmem:[%s258_s0 + $0x8] sm:$0xff]  ;;  %vm64_vm0 = vcmask 261120   ;;  %vm106_vm1 = vcmask 785408  }
   0x4   :  { %v163_v4 = vld [vmem:[%s258_s0 + $0x10] sm:$0xff]  ;;  %v164_v5 = vld [vmem:[%s258_s0 + $0x18] sm:$0xff]  ;;  %v176_v6 = vld [vmem:[%s260_s2] ss:$0 sm:$0xff]  ;;  %s203_s0 = smov [#allocation2]   ;;  %s121_s27 = sshll.u32 %s261_s3, 4  ;;  %s122_s27 = int_to_ptr.hbm [resolvable:$true] %s121_s27 }
   0x5   :  { %s119_s2 = sshll.u32 %s203_s0, 4  ;;  %s204_s28 = smov 128   ;;  %s120_s2 = int_to_ptr.vmem [resolvable:$true] %s119_s2 }
   0x6   :  { %84 = vmatpush.bf16.msra.mxu0 %v165_v1  ;;  %170 = vmatpush.bf16.msra.mxu1 %v165_v1  ;;  %s205_s29 = smov 8  }
   0x7   :  { %171 = vmatpush.bf16.msra.mxu2 %v165_v1  ;;  %172 = vmatpush.bf16.msra.mxu3 %v165_v1 }
   0x9   :  { %157 = vmatmul.msk.bf16.vlgmr.msra.gmra.mxu0 %vm64_vm0, %v161_v2  ;;  %158 = vmatmul.msk.bf16.vlgmr.msra.gmra.mxu1 %vm64_vm0, %v162_v3 }
   0xa   :  { %159 = vmatmul.msk.bf16.vlgmr.msra.gmra.mxu2 %vm64_vm0, %v163_v4  ;;  %160 = vmatmul.msk.bf16.vlgmr.msra.gmra.mxu3 %vm64_vm0, %v164_v5 }
  0x86   :  { %v86_v7 = vpop.f32.mrf.mxu0  ;;  %v91_v8 = vpop.f32.mrf.mxu1 }
  0x87   :  { %v87_v9 = vadd.f32 %v176_v6, %v86_v7  ;;  %v92_v10 = vadd.f32 %v176_v6, %v91_v8 }
  0x89   :  { %107 = vst.msk [vmem:[#allocation2] sm:$0xff] %vm106_vm1, %v87_v9 }
  0x8a   :  { %109 = vst.msk [vmem:[#allocation2 + $0x10] sm:$0xff] %vm106_vm1, %v92_v10 }
  0x8d   :  { %v96_v11 = vpop.f32.mrf.mxu2  ;;  %v101_v12 = vpop.f32.mrf.mxu3 }
  0x8e   :  { %v97_v13 = vadd.f32 %v176_v6, %v96_v11  ;;  %v102_v14 = vadd.f32 %v176_v6, %v101_v12  ;;  %v88_v15 = vpop.f32.mrf.mxu0  ;;  %v93_v16 = vpop.f32.mrf.mxu1 }
  0x8f   :  { %v89_v17 = vadd.f32 %v176_v6, %v88_v15  ;;  %v94_v18 = vadd.f32 %v176_v6, %v93_v16 }
  0x90   :  { %111 = vst.msk [vmem:[#allocation2 + $0x20] sm:$0xff] %vm106_vm1, %v97_v13 }
  0x91   :  { %113 = vst.msk [vmem:[#allocation2 + $0x30] sm:$0xff] %vm106_vm1, %v102_v14 }
  0x92   :  { %108 = vst.msk [vmem:[#allocation2 + $0x8] sm:$0xff] %vm106_vm1, %v89_v17 }
  0x93   :  { %110 = vst.msk [vmem:[#allocation2 + $0x18] sm:$0xff] %vm106_vm1, %v94_v18 }
  0x95   :  { %v98_v19 = vpop.f32.mrf.mxu2  ;;  %v103_v20 = vpop.f32.mrf.mxu3 }
  0x96   :  { %v99_v21 = vadd.f32 %v176_v6, %v98_v19  ;;  %v104_v22 = vadd.f32 %v176_v6, %v103_v20 }
  0x98   :  { %112 = vst.msk [vmem:[#allocation2 + $0x28] sm:$0xff] %vm106_vm1, %v99_v21 }
  0x99   :  { %114 = vst.msk [vmem:[#allocation2 + $0x38] sm:$0xff] %vm106_vm1, %v104_v22 }
  0x9a   :  { %127 = dma.vmem_to_hbm [thread:$0]  %s120_s2, 1024, %s122_s27, [#allocation3], %s204_s28, %s204_s28, %s205_s29  }
  0x9b   :  { %201 = dma.done.wait [#allocation3], 1024  }
  0x9c   :  { %202 = vsyncadd [#allocation3], 4294966272 }
  0x9d   :  { %132 = vsyncpa [#allocation3], 1 }

</bundles_post_ra>
